<compile_context>
chip_gen: v5e
topology: v5e:2x2
jax: 0.10.0
libtpu: 0.0.40
codegen_flags: <defaults>
</compile_context>

<pallas_src>
import jax
import jax.numpy as jnp
from jax.experimental import pallas as pl
from jax.experimental.pallas import tpu as pltpu

LANE = 128      # TPU lane width
SUBLANE = 8     # f32 sublane count


def _round_up(x, m):
    return (x + m - 1) // m * m


def lstm_regressor_kernel(x2d_ref, wih_ref, whh_ref, b_ref, wlin_ref, blin_ref,
                          out_ref, gx_ref):
    """Whole forward pass in one kernel invocation (no grid).

    x2d_ref:  (T*Bp, I)     time-major, batch-padded input, bf16
    wih_ref:  (I, 4*Hg)     input->gate weights, gate order [i,f,o,g], bf16
    whh_ref:  (Hg, 4*Hg)    hidden->gate weights, gate order [i,f,o,g], bf16
    b_ref:    (1, 4*Hg)     b_ih + b_hh (packed/reordered), f32
    wlin_ref: (1, Hg)       final Linear weight, f32
    blin_ref: (1, 1)        final Linear bias, f32
    out_ref:  (Bp, LANE)    lane-dense output (result broadcast across lanes)
    gx_ref:   (T, Bp, 4*Hg) VMEM scratch: hoisted input projection, f32
    """
    T, Bp, G = gx_ref.shape
    Hg = whh_ref.shape[0]

    # Hoisted input projection: ONE MXU matmul (bf16 operands, f32 accumulate)
    # for all timesteps, bias folded in; the serial loop only does h @ W_hh.
    gx_ref[...] = (
        jnp.dot(x2d_ref[...], wih_ref[...], preferred_element_type=jnp.float32)
        + b_ref[...]).reshape(T, Bp, G)

    h0 = jnp.zeros((Bp, Hg), jnp.float32)
    c0 = jnp.zeros((Bp, Hg), jnp.float32)

    def step(t, carry):
        h, c = carry
        # Only (Hg, 4*Hg) hidden weights stream through the MXU per step
        # (K = Hg = 32, not padded to 128).
        gates = gx_ref[t] + jnp.dot(h.astype(whh_ref.dtype), whh_ref[...],
                                    preferred_element_type=jnp.float32)
        # Packed gate order [i, f, o, g]: one sigmoid over lanes 0:3*Hg, one
        # tanh over 3*Hg:4*Hg.  Padded gate lanes (if H < Hg) provably keep
        # h = c = 0: pre-activations are 0 there, so c_new = 0.5*0 + 0.5*0 = 0.
        sg = jax.nn.sigmoid(gates[:, :3 * Hg])
        i_g = sg[:, 0 * Hg:1 * Hg]
        f_g = sg[:, 1 * Hg:2 * Hg]
        o_g = sg[:, 2 * Hg:3 * Hg]
        g_g = jnp.tanh(gates[:, 3 * Hg:4 * Hg])
        c_new = f_g * c + i_g * g_g
        h_new = o_g * jnp.tanh(c_new)
        return h_new, c_new

    # Full unroll at small T gives the LLO scheduler visibility; switch to
    # partial unroll (4-8) once T grows.
    h_last, _ = jax.lax.fori_loop(0, T, step, (h0, c0), unroll=True)

    # TODO(synk): train-mode dropout not implemented; eval-mode nn.Dropout is
    # identity, which matches this inference forward pass.
    # Final Linear(H, 1): VPU multiply + lane reduction (no N=1 MXU matmul);
    # store lane-dense and slice in the wrapper.
    res = (jnp.sum(h_last * wlin_ref[...], axis=-1, keepdims=True)
           + blin_ref[...])                          # (Bp, 1)
    out_ref[...] = jnp.broadcast_to(res, out_ref.shape)


def lstm_regressor(x, w_ih, w_hh, bias, w_lin, b_lin):
    """x: (T, B, I) time-major (PyTorch batch_first=False).
    w_ih: (I, 4H) = W_ih^T; w_hh: (H, 4H) = W_hh^T; both with PyTorch gate
    order [i, f, g, o]; bias: (4H,) = b_ih + b_hh; w_lin: (1, H); b_lin: (1,).
    Returns (B, 1) f32."""
    T, B, I = x.shape
    H = w_hh.shape[0]

    Bp = _round_up(max(B, SUBLANE), SUBLANE)   # fill the 8 sublanes
    # Per-gate lane width: compact packing (all 4 gates in <= 128 lanes) when
    # possible; otherwise fall back to per-gate 128-lane padding.
    Hg = _round_up(H, SUBLANE)
    if 4 * Hg > LANE:
        Hg = _round_up(H, LANE)
    G = 4 * Hg

    # Pad batch (padded rows never mix with real rows), flatten time, and cast
    # the MXU operand to bf16 (state / elementwise math stays f32 in-kernel).
    x_p = jnp.pad(x, ((0, 0), (0, Bp - B), (0, 0)))
    x_p = x_p.reshape(T * Bp, I).astype(jnp.bfloat16)

    def pack_gates(w, rows_to, dtype):
        # w: (rows, 4H) with PyTorch gate order [i, f, g, o] ->
        # (rows_to, 4*Hg) with gate order [i, f, o, g], each gate block
        # zero-padded from H to Hg lanes (zeros are exact in bf16 too).
        rows = w.shape[0]
        w4 = w.reshape(rows, 4, H)[:, [0, 1, 3, 2], :]
        w4 = jnp.pad(w4, ((0, rows_to - rows), (0, 0), (0, Hg - H)))
        return w4.reshape(rows_to, G).astype(dtype)

    w_ih_p = pack_gates(w_ih, I, jnp.bfloat16)                    # (I, G)
    w_hh_p = pack_gates(w_hh, Hg, jnp.bfloat16)                   # (Hg, G)
    bias_p = pack_gates(bias.reshape(1, 4 * H), 1, jnp.float32)   # (1, G)
    w_lin_p = jnp.pad(w_lin.reshape(1, H).astype(jnp.float32),
                      ((0, 0), (0, Hg - H)))                      # (1, Hg)
    b_lin_p = jnp.asarray(b_lin, jnp.float32).reshape(1, 1)

    out = pl.pallas_call(
        lstm_regressor_kernel,
        out_shape=jax.ShapeDtypeStruct((Bp, LANE), jnp.float32),
        in_specs=[pl.BlockSpec(memory_space=pltpu.MemorySpace.VMEM)] * 6,
        out_specs=pl.BlockSpec(memory_space=pltpu.MemorySpace.VMEM),
        scratch_shapes=[pltpu.VMEM((T, Bp, G), jnp.float32)],
    )(x_p, w_ih_p, w_hh_p, bias_p, w_lin_p, b_lin_p)

    return out[:B, :1]


def lstm_regressor_ref(x, w_ih, w_hh, bias, w_lin, b_lin):
    """Pure-JAX f32 reference (unpadded, PyTorch gate order) for checking."""
    T, B, _ = x.shape
    H = w_hh.shape[0]
    h = jnp.zeros((B, H), jnp.float32)
    c = jnp.zeros((B, H), jnp.float32)
    for t in range(T):
        gates = x[t] @ w_ih + h @ w_hh + bias
        i_g = jax.nn.sigmoid(gates[:, 0 * H:1 * H])
        f_g = jax.nn.sigmoid(gates[:, 1 * H:2 * H])
        g_g = jnp.tanh(gates[:, 2 * H:3 * H])
        o_g = jax.nn.sigmoid(gates[:, 3 * H:4 * H])
        c = f_g * c + i_g * g_g
        h = o_g * jnp.tanh(c)
    return h @ w_lin.T + b_lin


def xavier_normal(key, shape):
    fan_out, fan_in = shape
    std = (2.0 / (fan_in + fan_out)) ** 0.5
    return std * jax.random.normal(key, shape, dtype=jnp.float32)


if __name__ == "__main__":
    # Small shapes consistent with the module: seq=8, batch=2, input=16, hidden=32.
    T, B, I, H = 8, 2, 16, 32

    key = jax.random.PRNGKey(0)
    k_x, k_ih, k_hh, k_lin = jax.random.split(key, 4)

    x = jax.random.normal(k_x, (T, B, I), dtype=jnp.float32)

    # LSTM params: xavier_normal weights (as in init_rnn), zero biases.
    w_ih_pt = xavier_normal(k_ih, (4 * H, I))      # PyTorch layout (4H, I)
    w_hh_pt = xavier_normal(k_hh, (4 * H, H))      # PyTorch layout (4H, H)
    w_ih = w_ih_pt.T                               # (I, 4H) for x @ W
    w_hh = w_hh_pt.T                               # (H, 4H) for h @ W
    b_ih = jnp.zeros((4 * H,), jnp.float32)
    b_hh = jnp.zeros((4 * H,), jnp.float32)
    bias = b_ih + b_hh                             # PyTorch adds both biases

    # Linear(H, 1) params (deterministic init for the test).
    w_lin = xavier_normal(k_lin, (1, H))           # PyTorch layout (out, in)
    b_lin = jnp.zeros((1,), jnp.float32)

    out = jax.block_until_ready(
        lstm_regressor(x, w_ih, w_hh, bias, w_lin, b_lin))
    ref = lstm_regressor_ref(x, w_ih, w_hh, bias, w_lin, b_lin)

    assert out.shape == (B, 1), out.shape
    # MXU operands are bf16 (f32 accumulate / f32 state), so compare against
    # the pure-f32 reference with a bf16-appropriate tolerance.
    assert jnp.allclose(out, ref, atol=2e-2, rtol=2e-2), (out, ref)

    print("KERNEL_OK")
</pallas_src>

<mosaic_0001>
module attributes {stable_mosaic.version = 11 : i64} {
  func.func @lstm_regressor_kernel(%arg0: memref<64x16xbf16, #tpu.memory_space<vmem>>, %arg1: memref<16x128xbf16, #tpu.memory_space<vmem>>, %arg2: memref<32x128xbf16, #tpu.memory_space<vmem>>, %arg3: memref<1x128xf32, #tpu.memory_space<vmem>>, %arg4: memref<1x32xf32, #tpu.memory_space<vmem>>, %arg5: memref<1x1xf32, #tpu.memory_space<vmem>>, %arg6: memref<8x128xf32, #tpu.memory_space<vmem>>, %arg7: memref<8x8x128xf32, #tpu.memory_space<vmem>>) attributes {dimension_semantics = [], scalar_prefetch = 0 : i64, scratch_operands = 1 : i64, tpu.core_type = #tpu.core_type<tc>} {
    %c0 = arith.constant 0 : index
    %c0_0 = arith.constant 0 : index
    %0 = vector.load %arg0[%c0, %c0_0] : memref<64x16xbf16, #tpu.memory_space<vmem>>, vector<64x16xbf16>
    %c0_1 = arith.constant 0 : index
    %c0_2 = arith.constant 0 : index
    %1 = vector.load %arg1[%c0_1, %c0_2] : memref<16x128xbf16, #tpu.memory_space<vmem>>, vector<16x128xbf16>
    %cst = arith.constant dense<0.000000e+00> : vector<64x128xf32>
    %2 = tpu.matmul %0, %1, %cst {dimension_numbers = #tpu.dot_dimension_numbers<[1], [0], [0], [1], [0, 0, 1, 1], [], []>} : vector<64x16xbf16>, vector<16x128xbf16>, vector<64x128xf32> -> vector<64x128xf32>
    %c0_3 = arith.constant 0 : index
    %c0_4 = arith.constant 0 : index
    %3 = vector.load %arg3[%c0_3, %c0_4] : memref<1x128xf32, #tpu.memory_space<vmem>>, vector<1x128xf32>
    %4 = vector.broadcast %3 : vector<1x128xf32> to vector<64x128xf32>
    %5 = arith.addf %2, %4 : vector<64x128xf32>
    %6 = vector.shape_cast %5 : vector<64x128xf32> to vector<8x8x128xf32>
    %c0_5 = arith.constant 0 : index
    %c0_6 = arith.constant 0 : index
    %c0_7 = arith.constant 0 : index
    %7 = vector.load %arg7[%c0_5, %c0_6, %c0_7] : memref<8x8x128xf32, #tpu.memory_space<vmem>>, vector<8x8x128xf32>
    tpu.vector_store %arg7[%c0_5, %c0_6, %c0_7], %6 {strides = array<i32>} : memref<8x8x128xf32, #tpu.memory_space<vmem>>, vector<8x8x128xf32>,
    %cst_8 = arith.constant 0.000000e+00 : f32
    %8 = vector.broadcast %cst_8 : f32 to vector<8x32xf32>
    %cst_9 = arith.constant 0.000000e+00 : f32
    %9 = vector.broadcast %cst_9 : f32 to vector<8x32xf32>
    %c0_i32 = arith.constant 0 : i32
    %10 = arith.index_cast %c0_i32 : i32 to index
    %c0_10 = arith.constant 0 : index
    %c0_11 = arith.constant 0 : index
    %11 = vector.load %arg7[%10, %c0_10, %c0_11] : memref<8x8x128xf32, #tpu.memory_space<vmem>>, vector<1x8x128xf32>
    %12 = vector.shape_cast %11 : vector<1x8x128xf32> to vector<8x128xf32>
    %13 = arith.truncf %8 : vector<8x32xf32> to vector<8x32xbf16>
    %c0_12 = arith.constant 0 : index
    %c0_13 = arith.constant 0 : index
    %14 = vector.load %arg2[%c0_12, %c0_13] : memref<32x128xbf16, #tpu.memory_space<vmem>>, vector<32x128xbf16>
    %cst_14 = arith.constant dense<0.000000e+00> : vector<8x128xf32>
    %15 = tpu.matmul %13, %14, %cst_14 {dimension_numbers = #tpu.dot_dimension_numbers<[1], [0], [0], [1], [0, 0, 1, 1], [], []>} : vector<8x32xbf16>, vector<32x128xbf16>, vector<8x128xf32> -> vector<8x128xf32>
    %16 = arith.addf %12, %15 : vector<8x128xf32>
    %17 = vector.extract_strided_slice %16 {offsets = [0, 0], sizes = [8, 96], strides = [1, 1]} : vector<8x128xf32> to vector<8x96xf32>
    %18 = arith.negf %17 : vector<8x96xf32>
    %19 = math.exp %18 : vector<8x96xf32>
    %cst_15 = arith.constant 1.000000e+00 : f32
    %20 = vector.broadcast %cst_15 : f32 to vector<8x96xf32>
    %21 = arith.addf %20, %19 : vector<8x96xf32>
    %22 = arith.divf %20, %21 : vector<8x96xf32>
    %23 = vector.extract_strided_slice %22 {offsets = [0, 0], sizes = [8, 32], strides = [1, 1]} : vector<8x96xf32> to vector<8x32xf32>
    %24 = vector.extract_strided_slice %22 {offsets = [0, 32], sizes = [8, 32], strides = [1, 1]} : vector<8x96xf32> to vector<8x32xf32>
    %25 = vector.extract_strided_slice %22 {offsets = [0, 64], sizes = [8, 32], strides = [1, 1]} : vector<8x96xf32> to vector<8x32xf32>
    %26 = vector.extract_strided_slice %16 {offsets = [0, 96], sizes = [8, 32], strides = [1, 1]} : vector<8x128xf32> to vector<8x32xf32>
    %27 = math.tanh %26 : vector<8x32xf32>
    %28 = arith.mulf %24, %9 : vector<8x32xf32>
    %29 = arith.mulf %23, %27 : vector<8x32xf32>
    %30 = arith.addf %28, %29 : vector<8x32xf32>
    %31 = math.tanh %30 : vector<8x32xf32>
    %32 = arith.mulf %25, %31 : vector<8x32xf32>
    %c1_i32 = arith.constant 1 : i32
    %33 = arith.index_cast %c1_i32 : i32 to index
    %c0_16 = arith.constant 0 : index
    %c0_17 = arith.constant 0 : index
    %34 = vector.load %arg7[%33, %c0_16, %c0_17] : memref<8x8x128xf32, #tpu.memory_space<vmem>>, vector<1x8x128xf32>
    %35 = vector.shape_cast %34 : vector<1x8x128xf32> to vector<8x128xf32>
    %36 = arith.truncf %32 : vector<8x32xf32> to vector<8x32xbf16>
    %c0_18 = arith.constant 0 : index
    %c0_19 = arith.constant 0 : index
    %37 = vector.load %arg2[%c0_18, %c0_19] : memref<32x128xbf16, #tpu.memory_space<vmem>>, vector<32x128xbf16>
    %cst_20 = arith.constant dense<0.000000e+00> : vector<8x128xf32>
    %38 = tpu.matmul %36, %37, %cst_20 {dimension_numbers = #tpu.dot_dimension_numbers<[1], [0], [0], [1], [0, 0, 1, 1], [], []>} : vector<8x32xbf16>, vector<32x128xbf16>, vector<8x128xf32> -> vector<8x128xf32>
    %39 = arith.addf %35, %38 : vector<8x128xf32>
    %40 = vector.extract_strided_slice %39 {offsets = [0, 0], sizes = [8, 96], strides = [1, 1]} : vector<8x128xf32> to vector<8x96xf32>
    %41 = arith.negf %40 : vector<8x96xf32>
    %42 = math.exp %41 : vector<8x96xf32>
    %cst_21 = arith.constant 1.000000e+00 : f32
    %43 = vector.broadcast %cst_21 : f32 to vector<8x96xf32>
    %44 = arith.addf %43, %42 : vector<8x96xf32>
    %45 = arith.divf %43, %44 : vector<8x96xf32>
    %46 = vector.extract_strided_slice %45 {offsets = [0, 0], sizes = [8, 32], strides = [1, 1]} : vector<8x96xf32> to vector<8x32xf32>
    %47 = vector.extract_strided_slice %45 {offsets = [0, 32], sizes = [8, 32], strides = [1, 1]} : vector<8x96xf32> to vector<8x32xf32>
    %48 = vector.extract_strided_slice %45 {offsets = [0, 64], sizes = [8, 32], strides = [1, 1]} : vector<8x96xf32> to vector<8x32xf32>
    %49 = vector.extract_strided_slice %39 {offsets = [0, 96], sizes = [8, 32], strides = [1, 1]} : vector<8x128xf32> to vector<8x32xf32>
    %50 = math.tanh %49 : vector<8x32xf32>
    %51 = arith.mulf %47, %30 : vector<8x32xf32>
    %52 = arith.mulf %46, %50 : vector<8x32xf32>
    %53 = arith.addf %51, %52 : vector<8x32xf32>
    %54 = math.tanh %53 : vector<8x32xf32>
    %55 = arith.mulf %48, %54 : vector<8x32xf32>
    %c2_i32 = arith.constant 2 : i32
    %56 = arith.index_cast %c2_i32 : i32 to index
    %c0_22 = arith.constant 0 : index
    %c0_23 = arith.constant 0 : index
    %57 = vector.load %arg7[%56, %c0_22, %c0_23] : memref<8x8x128xf32, #tpu.memory_space<vmem>>, vector<1x8x128xf32>
    %58 = vector.shape_cast %57 : vector<1x8x128xf32> to vector<8x128xf32>
    %59 = arith.truncf %55 : vector<8x32xf32> to vector<8x32xbf16>
    %c0_24 = arith.constant 0 : index
    %c0_25 = arith.constant 0 : index
    %60 = vector.load %arg2[%c0_24, %c0_25] : memref<32x128xbf16, #tpu.memory_space<vmem>>, vector<32x128xbf16>
    %cst_26 = arith.constant dense<0.000000e+00> : vector<8x128xf32>
    %61 = tpu.matmul %59, %60, %cst_26 {dimension_numbers = #tpu.dot_dimension_numbers<[1], [0], [0], [1], [0, 0, 1, 1], [], []>} : vector<8x32xbf16>, vector<32x128xbf16>, vector<8x128xf32> -> vector<8x128xf32>
    %62 = arith.addf %58, %61 : vector<8x128xf32>
    %63 = vector.extract_strided_slice %62 {offsets = [0, 0], sizes = [8, 96], strides = [1, 1]} : vector<8x128xf32> to vector<8x96xf32>
    %64 = arith.negf %63 : vector<8x96xf32>
    %65 = math.exp %64 : vector<8x96xf32>
    %cst_27 = arith.constant 1.000000e+00 : f32
    %66 = vector.broadcast %cst_27 : f32 to vector<8x96xf32>
    %67 = arith.addf %66, %65 : vector<8x96xf32>
    %68 = arith.divf %66, %67 : vector<8x96xf32>
    %69 = vector.extract_strided_slice %68 {offsets = [0, 0], sizes = [8, 32], strides = [1, 1]} : vector<8x96xf32> to vector<8x32xf32>
    %70 = vector.extract_strided_slice %68 {offsets = [0, 32], sizes = [8, 32], strides = [1, 1]} : vector<8x96xf32> to vector<8x32xf32>
    %71 = vector.extract_strided_slice %68 {offsets = [0, 64], sizes = [8, 32], strides = [1, 1]} : vector<8x96xf32> to vector<8x32xf32>
    %72 = vector.extract_strided_slice %62 {offsets = [0, 96], sizes = [8, 32], strides = [1, 1]} : vector<8x128xf32> to vector<8x32xf32>
    %73 = math.tanh %72 : vector<8x32xf32>
    %74 = arith.mulf %70, %53 : vector<8x32xf32>
    %75 = arith.mulf %69, %73 : vector<8x32xf32>
    %76 = arith.addf %74, %75 : vector<8x32xf32>
    %77 = math.tanh %76 : vector<8x32xf32>
    %78 = arith.mulf %71, %77 : vector<8x32xf32>
    %c3_i32 = arith.constant 3 : i32
    %79 = arith.index_cast %c3_i32 : i32 to index
    %c0_28 = arith.constant 0 : index
    %c0_29 = arith.constant 0 : index
    %80 = vector.load %arg7[%79, %c0_28, %c0_29] : memref<8x8x128xf32, #tpu.memory_space<vmem>>, vector<1x8x128xf32>
    %81 = vector.shape_cast %80 : vector<1x8x128xf32> to vector<8x128xf32>
    %82 = arith.truncf %78 : vector<8x32xf32> to vector<8x32xbf16>
    %c0_30 = arith.constant 0 : index
    %c0_31 = arith.constant 0 : index
    %83 = vector.load %arg2[%c0_30, %c0_31] : memref<32x128xbf16, #tpu.memory_space<vmem>>, vector<32x128xbf16>
    %cst_32 = arith.constant dense<0.000000e+00> : vector<8x128xf32>
    %84 = tpu.matmul %82, %83, %cst_32 {dimension_numbers = #tpu.dot_dimension_numbers<[1], [0], [0], [1], [0, 0, 1, 1], [], []>} : vector<8x32xbf16>, vector<32x128xbf16>, vector<8x128xf32> -> vector<8x128xf32>
    %85 = arith.addf %81, %84 : vector<8x128xf32>
    %86 = vector.extract_strided_slice %85 {offsets = [0, 0], sizes = [8, 96], strides = [1, 1]} : vector<8x128xf32> to vector<8x96xf32>
    %87 = arith.negf %86 : vector<8x96xf32>
    %88 = math.exp %87 : vector<8x96xf32>
    %cst_33 = arith.constant 1.000000e+00 : f32
    %89 = vector.broadcast %cst_33 : f32 to vector<8x96xf32>
    %90 = arith.addf %89, %88 : vector<8x96xf32>
    %91 = arith.divf %89, %90 : vector<8x96xf32>
    %92 = vector.extract_strided_slice %91 {offsets = [0, 0], sizes = [8, 32], strides = [1, 1]} : vector<8x96xf32> to vector<8x32xf32>
    %93 = vector.extract_strided_slice %91 {offsets = [0, 32], sizes = [8, 32], strides = [1, 1]} : vector<8x96xf32> to vector<8x32xf32>
    %94 = vector.extract_strided_slice %91 {offsets = [0, 64], sizes = [8, 32], strides = [1, 1]} : vector<8x96xf32> to vector<8x32xf32>
    %95 = vector.extract_strided_slice %85 {offsets = [0, 96], sizes = [8, 32], strides = [1, 1]} : vector<8x128xf32> to vector<8x32xf32>
    %96 = math.tanh %95 : vector<8x32xf32>
    %97 = arith.mulf %93, %76 : vector<8x32xf32>
    %98 = arith.mulf %92, %96 : vector<8x32xf32>
    %99 = arith.addf %97, %98 : vector<8x32xf32>
    %100 = math.tanh %99 : vector<8x32xf32>
    %101 = arith.mulf %94, %100 : vector<8x32xf32>
    %c4_i32 = arith.constant 4 : i32
    %102 = arith.index_cast %c4_i32 : i32 to index
    %c0_34 = arith.constant 0 : index
    %c0_35 = arith.constant 0 : index
    %103 = vector.load %arg7[%102, %c0_34, %c0_35] : memref<8x8x128xf32, #tpu.memory_space<vmem>>, vector<1x8x128xf32>
    %104 = vector.shape_cast %103 : vector<1x8x128xf32> to vector<8x128xf32>
    %105 = arith.truncf %101 : vector<8x32xf32> to vector<8x32xbf16>
    %c0_36 = arith.constant 0 : index
    %c0_37 = arith.constant 0 : index
    %106 = vector.load %arg2[%c0_36, %c0_37] : memref<32x128xbf16, #tpu.memory_space<vmem>>, vector<32x128xbf16>
    %cst_38 = arith.constant dense<0.000000e+00> : vector<8x128xf32>
    %107 = tpu.matmul %105, %106, %cst_38 {dimension_numbers = #tpu.dot_dimension_numbers<[1], [0], [0], [1], [0, 0, 1, 1], [], []>} : vector<8x32xbf16>, vector<32x128xbf16>, vector<8x128xf32> -> vector<8x128xf32>
    %108 = arith.addf %104, %107 : vector<8x128xf32>
    %109 = vector.extract_strided_slice %108 {offsets = [0, 0], sizes = [8, 96], strides = [1, 1]} : vector<8x128xf32> to vector<8x96xf32>
    %110 = arith.negf %109 : vector<8x96xf32>
    %111 = math.exp %110 : vector<8x96xf32>
    %cst_39 = arith.constant 1.000000e+00 : f32
    %112 = vector.broadcast %cst_39 : f32 to vector<8x96xf32>
    %113 = arith.addf %112, %111 : vector<8x96xf32>
    %114 = arith.divf %112, %113 : vector<8x96xf32>
    %115 = vector.extract_strided_slice %114 {offsets = [0, 0], sizes = [8, 32], strides = [1, 1]} : vector<8x96xf32> to vector<8x32xf32>
    %116 = vector.extract_strided_slice %114 {offsets = [0, 32], sizes = [8, 32], strides = [1, 1]} : vector<8x96xf32> to vector<8x32xf32>
    %117 = vector.extract_strided_slice %114 {offsets = [0, 64], sizes = [8, 32], strides = [1, 1]} : vector<8x96xf32> to vector<8x32xf32>
    %118 = vector.extract_strided_slice %108 {offsets = [0, 96], sizes = [8, 32], strides = [1, 1]} : vector<8x128xf32> to vector<8x32xf32>
    %119 = math.tanh %118 : vector<8x32xf32>
    %120 = arith.mulf %116, %99 : vector<8x32xf32>
    %121 = arith.mulf %115, %119 : vector<8x32xf32>
    %122 = arith.addf %120, %121 : vector<8x32xf32>
    %123 = math.tanh %122 : vector<8x32xf32>
    %124 = arith.mulf %117, %123 : vector<8x32xf32>
    %c5_i32 = arith.constant 5 : i32
    %125 = arith.index_cast %c5_i32 : i32 to index
    %c0_40 = arith.constant 0 : index
    %c0_41 = arith.constant 0 : index
    %126 = vector.load %arg7[%125, %c0_40, %c0_41] : memref<8x8x128xf32, #tpu.memory_space<vmem>>, vector<1x8x128xf32>
    %127 = vector.shape_cast %126 : vector<1x8x128xf32> to vector<8x128xf32>
    %128 = arith.truncf %124 : vector<8x32xf32> to vector<8x32xbf16>
    %c0_42 = arith.constant 0 : index
    %c0_43 = arith.constant 0 : index
    %129 = vector.load %arg2[%c0_42, %c0_43] : memref<32x128xbf16, #tpu.memory_space<vmem>>, vector<32x128xbf16>
    %cst_44 = arith.constant dense<0.000000e+00> : vector<8x128xf32>
    %130 = tpu.matmul %128, %129, %cst_44 {dimension_numbers = #tpu.dot_dimension_numbers<[1], [0], [0], [1], [0, 0, 1, 1], [], []>} : vector<8x32xbf16>, vector<32x128xbf16>, vector<8x128xf32> -> vector<8x128xf32>
    %131 = arith.addf %127, %130 : vector<8x128xf32>
    %132 = vector.extract_strided_slice %131 {offsets = [0, 0], sizes = [8, 96], strides = [1, 1]} : vector<8x128xf32> to vector<8x96xf32>
    %133 = arith.negf %132 : vector<8x96xf32>
    %134 = math.exp %133 : vector<8x96xf32>
    %cst_45 = arith.constant 1.000000e+00 : f32
    %135 = vector.broadcast %cst_45 : f32 to vector<8x96xf32>
    %136 = arith.addf %135, %134 : vector<8x96xf32>
    %137 = arith.divf %135, %136 : vector<8x96xf32>
    %138 = vector.extract_strided_slice %137 {offsets = [0, 0], sizes = [8, 32], strides = [1, 1]} : vector<8x96xf32> to vector<8x32xf32>
    %139 = vector.extract_strided_slice %137 {offsets = [0, 32], sizes = [8, 32], strides = [1, 1]} : vector<8x96xf32> to vector<8x32xf32>
    %140 = vector.extract_strided_slice %137 {offsets = [0, 64], sizes = [8, 32], strides = [1, 1]} : vector<8x96xf32> to vector<8x32xf32>
    %141 = vector.extract_strided_slice %131 {offsets = [0, 96], sizes = [8, 32], strides = [1, 1]} : vector<8x128xf32> to vector<8x32xf32>
    %142 = math.tanh %141 : vector<8x32xf32>
    %143 = arith.mulf %139, %122 : vector<8x32xf32>
    %144 = arith.mulf %138, %142 : vector<8x32xf32>
    %145 = arith.addf %143, %144 : vector<8x32xf32>
    %146 = math.tanh %145 : vector<8x32xf32>
    %147 = arith.mulf %140, %146 : vector<8x32xf32>
    %c6_i32 = arith.constant 6 : i32
    %148 = arith.index_cast %c6_i32 : i32 to index
    %c0_46 = arith.constant 0 : index
    %c0_47 = arith.constant 0 : index
    %149 = vector.load %arg7[%148, %c0_46, %c0_47] : memref<8x8x128xf32, #tpu.memory_space<vmem>>, vector<1x8x128xf32>
    %150 = vector.shape_cast %149 : vector<1x8x128xf32> to vector<8x128xf32>
    %151 = arith.truncf %147 : vector<8x32xf32> to vector<8x32xbf16>
    %c0_48 = arith.constant 0 : index
    %c0_49 = arith.constant 0 : index
    %152 = vector.load %arg2[%c0_48, %c0_49] : memref<32x128xbf16, #tpu.memory_space<vmem>>, vector<32x128xbf16>
    %cst_50 = arith.constant dense<0.000000e+00> : vector<8x128xf32>
    %153 = tpu.matmul %151, %152, %cst_50 {dimension_numbers = #tpu.dot_dimension_numbers<[1], [0], [0], [1], [0, 0, 1, 1], [], []>} : vector<8x32xbf16>, vector<32x128xbf16>, vector<8x128xf32> -> vector<8x128xf32>
    %154 = arith.addf %150, %153 : vector<8x128xf32>
    %155 = vector.extract_strided_slice %154 {offsets = [0, 0], sizes = [8, 96], strides = [1, 1]} : vector<8x128xf32> to vector<8x96xf32>
    %156 = arith.negf %155 : vector<8x96xf32>
    %157 = math.exp %156 : vector<8x96xf32>
    %cst_51 = arith.constant 1.000000e+00 : f32
    %158 = vector.broadcast %cst_51 : f32 to vector<8x96xf32>
    %159 = arith.addf %158, %157 : vector<8x96xf32>
    %160 = arith.divf %158, %159 : vector<8x96xf32>
    %161 = vector.extract_strided_slice %160 {offsets = [0, 0], sizes = [8, 32], strides = [1, 1]} : vector<8x96xf32> to vector<8x32xf32>
    %162 = vector.extract_strided_slice %160 {offsets = [0, 32], sizes = [8, 32], strides = [1, 1]} : vector<8x96xf32> to vector<8x32xf32>
    %163 = vector.extract_strided_slice %160 {offsets = [0, 64], sizes = [8, 32], strides = [1, 1]} : vector<8x96xf32> to vector<8x32xf32>
    %164 = vector.extract_strided_slice %154 {offsets = [0, 96], sizes = [8, 32], strides = [1, 1]} : vector<8x128xf32> to vector<8x32xf32>
    %165 = math.tanh %164 : vector<8x32xf32>
    %166 = arith.mulf %162, %145 : vector<8x32xf32>
    %167 = arith.mulf %161, %165 : vector<8x32xf32>
    %168 = arith.addf %166, %167 : vector<8x32xf32>
    %169 = math.tanh %168 : vector<8x32xf32>
    %170 = arith.mulf %163, %169 : vector<8x32xf32>
    %c7_i32 = arith.constant 7 : i32
    %171 = arith.index_cast %c7_i32 : i32 to index
    %c0_52 = arith.constant 0 : index
    %c0_53 = arith.constant 0 : index
    %172 = vector.load %arg7[%171, %c0_52, %c0_53] : memref<8x8x128xf32, #tpu.memory_space<vmem>>, vector<1x8x128xf32>
    %173 = vector.shape_cast %172 : vector<1x8x128xf32> to vector<8x128xf32>
    %174 = arith.truncf %170 : vector<8x32xf32> to vector<8x32xbf16>
    %c0_54 = arith.constant 0 : index
    %c0_55 = arith.constant 0 : index
    %175 = vector.load %arg2[%c0_54, %c0_55] : memref<32x128xbf16, #tpu.memory_space<vmem>>, vector<32x128xbf16>
    %cst_56 = arith.constant dense<0.000000e+00> : vector<8x128xf32>
    %176 = tpu.matmul %174, %175, %cst_56 {dimension_numbers = #tpu.dot_dimension_numbers<[1], [0], [0], [1], [0, 0, 1, 1], [], []>} : vector<8x32xbf16>, vector<32x128xbf16>, vector<8x128xf32> -> vector<8x128xf32>
    %177 = arith.addf %173, %176 : vector<8x128xf32>
    %178 = vector.extract_strided_slice %177 {offsets = [0, 0], sizes = [8, 96], strides = [1, 1]} : vector<8x128xf32> to vector<8x96xf32>
    %179 = arith.negf %178 : vector<8x96xf32>
    %180 = math.exp %179 : vector<8x96xf32>
    %cst_57 = arith.constant 1.000000e+00 : f32
    %181 = vector.broadcast %cst_57 : f32 to vector<8x96xf32>
    %182 = arith.addf %181, %180 : vector<8x96xf32>
    %183 = arith.divf %181, %182 : vector<8x96xf32>
    %184 = vector.extract_strided_slice %183 {offsets = [0, 0], sizes = [8, 32], strides = [1, 1]} : vector<8x96xf32> to vector<8x32xf32>
    %185 = vector.extract_strided_slice %183 {offsets = [0, 32], sizes = [8, 32], strides = [1, 1]} : vector<8x96xf32> to vector<8x32xf32>
    %186 = vector.extract_strided_slice %183 {offsets = [0, 64], sizes = [8, 32], strides = [1, 1]} : vector<8x96xf32> to vector<8x32xf32>
    %187 = vector.extract_strided_slice %177 {offsets = [0, 96], sizes = [8, 32], strides = [1, 1]} : vector<8x128xf32> to vector<8x32xf32>
    %188 = math.tanh %187 : vector<8x32xf32>
    %189 = arith.mulf %185, %168 : vector<8x32xf32>
    %190 = arith.mulf %184, %188 : vector<8x32xf32>
    %191 = arith.addf %189, %190 : vector<8x32xf32>
    %192 = math.tanh %191 : vector<8x32xf32>
    %193 = arith.mulf %186, %192 : vector<8x32xf32>
    %c8_i32 = arith.constant 8 : i32
    %c0_58 = arith.constant 0 : index
    %c0_59 = arith.constant 0 : index
    %194 = vector.load %arg4[%c0_58, %c0_59] : memref<1x32xf32, #tpu.memory_space<vmem>>, vector<1x32xf32>
    %195 = vector.broadcast %194 : vector<1x32xf32> to vector<8x32xf32>
    %196 = arith.mulf %193, %195 : vector<8x32xf32>
    %cst_60 = arith.constant dense<0.000000e+00> : vector<8xf32>
    %197 = vector.multi_reduction <add>, %196, %cst_60 [1] : vector<8x32xf32> to vector<8xf32>
    %198 = vector.shape_cast %197 : vector<8xf32> to vector<8x1xf32>
    %c0_61 = arith.constant 0 : index
    %c0_62 = arith.constant 0 : index
    %199 = vector.load %arg5[%c0_61, %c0_62] : memref<1x1xf32, #tpu.memory_space<vmem>>, vector<1x1xf32>
    %200 = vector.broadcast %199 : vector<1x1xf32> to vector<8x1xf32>
    %201 = arith.addf %198, %200 : vector<8x1xf32>
    %202 = vector.shape_cast %201 : vector<8x1xf32> to vector<8x1xf32>
    %203 = vector.broadcast %202 : vector<8x1xf32> to vector<8x128xf32>
    %c0_63 = arith.constant 0 : index
    %c0_64 = arith.constant 0 : index
    %204 = vector.load %arg6[%c0_63, %c0_64] : memref<8x128xf32, #tpu.memory_space<vmem>>, vector<8x128xf32>
    tpu.vector_store %arg6[%c0_63, %c0_64], %203 {strides = array<i32>} : memref<8x128xf32, #tpu.memory_space<vmem>>, vector<8x128xf32>,
    return
  }
}

</mosaic_0001>

<bundles_post_ra>
// kernel: tpu_custom_call.1
= control target key start
LH: loop header
LB: loop body
LE: loop exit
PB: predicated region body
PF: predicated region fallthrough
CT: control target
= control target key end

     0   :  { %s950_s0 = inlined_call_operand.vmem [shape: bf16[64,16], index: 0, kind: input, shape index: {}]   ;;  %s951_s1 = inlined_call_operand.vmem [shape: bf16[16,128], index: 1, kind: input, shape index: {}]   ;;  %s952_s2 = inlined_call_operand.vmem [shape: bf16[32,128], index: 2, kind: input, shape index: {}]   ;;  %s953_s3 = inlined_call_operand.vmem [shape: f32[1,128], index: 3, kind: input, shape index: {}]   ;;  %s954_s4 = inlined_call_operand.vmem [shape: f32[1,32], index: 4, kind: input, shape index: {}]   ;;  %s955_s5 = inlined_call_operand.<no memory space> [shape: f32[1,1], index: 5, kind: input, shape index: {}]   ;;  %s956_s6 = inlined_call_operand.hbm [shape: f32[8,128], index: 6, kind: output, shape index: {}]  }
   0x1   :  { %v11_v0 = vstv %s955_s5 }
   0x2   :  { %12 = vst [vmem:[#allocation3] sm:$0x1] %v11_v0 }
   0x3   :  { %v701_v1 = vld [vmem:[%s951_s1] sm:$0xff]  ;;  %v851_v2 = vld [vmem:[%s952_s2 + $0x8] sm:$0xff]  ;;  %vm67_vm0 = vcmask 130048   ;;  %v803_v5 = vmov 0  }
   0x4   :  { %v697_v3 = vld [vmem:[%s950_s0] sm:$0xff]  ;;  %708 = vset.pattern.permute.xlu1 %v803_v5  ;;  %709 = vset.pattern.permute.xlu0 %v803_v5 }
   0x5   :  { %v859_v4 = vld [vmem:[%s952_s2] sm:$0xff]  ;;  %87 = vmatpush.bf16.msra.mxu0 %v701_v1  ;;  %144 = vmatpush.bf16.msra.mxu1 %v851_v2 }
   0x6   :  { %13 = vsyncpa [#allocation5], 0  ;;  %204 = vmatpush.bf16.msra.mxu2 %v851_v2  ;;  %264 = vmatpush.bf16.msra.mxu3 %v851_v2  ;;  %v879_v6 = vld [vmem:[%s953_s3] ss:$0 sm:$0xff]  ;;  %s804_s5 = smov 32   ;;  %s805_s3 = smov 64  }
   0x7   :  { %vm134_vm5 = vcmask 261120   ;;  %v698_v61 = vld [vmem:[%s950_s0 + $0x8] sm:$0xff]  ;;  %s641_s17 = sshll.u32 %s956_s6, 4  ;;  %s642_s17 = int_to_ptr.hbm [resolvable:$true] %s641_s17 }
   0x8   :  { %670 = vmatmul.msk.bf16.vlgmr.msra.gmra.mxu0 %vm67_vm0, %v697_v3 }
   0x9   :  { %145 = vmatpush.bf16.msra.mxu1 %v859_v4 }
   0xa   :  { %205 = vmatpush.bf16.msra.mxu2 %v859_v4  ;;  %265 = vmatpush.bf16.msra.mxu3 %v859_v4 }
   0xc   :  { %146 = vmatmul.bf16.vlgmr.msra.gmra.mxu1 %v803_v5 }
   0xd   :  { %324 = vmatpush.bf16.msrb.mxu1 %v851_v2 }
   0xe   :  { %384 = vmatpush.bf16.msrb.mxu2 %v851_v2  ;;  %444 = vmatpush.bf16.msrb.mxu3 %v851_v2 }
  0x11   :  { %325 = vmatpush.bf16.msrb.mxu1 %v859_v4 }
  0x12   :  { %385 = vmatpush.bf16.msrb.mxu2 %v859_v4  ;;  %445 = vmatpush.bf16.msrb.mxu3 %v859_v4 }
  0x15   :  { %504 = vmatpush.bf16.msra.mxu1 %v851_v2 }
  0x18   :  { %671 = vmatmul.msk.bf16.gmra.mxu0 %vm67_vm0, %v698_v61 }
  0x19   :  { %505 = vmatpush.bf16.msra.mxu1 %v859_v4 }
  0x85   :  { %v89_v7 = vpop.f32.mrf.mxu0 }
  0x86   :  { %v90_v8 = vadd.f32 %v879_v6, %v89_v7 }
  0x89   :  { %v147_v9 = vpop.f32.mrf.mxu1 }
  0x8a   :  { %v151_v10 = vadd.f32 %v147_v9, %v90_v8 }
  0x8c   :  { %713 = vtanh.f32 %v151_v10  ;;  %v682_v13 = vmul.f32 -1.442695, %v151_v10 }
  0x8d   :  { %v91_v36 = vpop.f32.mrf.mxu0 }
  0x8e   :  { %715 = vpow2.f32 %v682_v13  ;;  %v92_v37 = vadd.f32 %v879_v6, %v91_v36 }
  0x91   :  { %v149_v11 = vpop.f32.mrf.mxu1 }
  0x92   :  { %v714_v12 = vpop.eup %713 }
  0x93   :  { %174 = vrot.lane.b32.xlu0 %v714_v12, %s804_s5 }
  0x94   :  { %v716_v14 = vpop.eup %715 }
  0x95   :  { %v155_v15 = vadd.f32 1.0, %v716_v14 }
  0x97   :  { %717 = vrcp.f32 %v155_v15  ;;  %v167_v21 = vand.u32 2147483648, %v155_v15  ;;  %vm161_vm2 = vweird.f32 %v155_v15  ;;  %v165_v22 = vand.u32 2147483647, %v155_v15 }
  0x99   :  { %v168_v24 = vor.u32 1.1754944e-38, %v167_v21  ;;  %vm166_vm4 = vcmp.eq.f32.partialorder %v165_v22, 8.507059e+37 }
  0x9d   :  { %v718_v16 = vpop.eup %717 }
  0x9e   :  { %v157_v17 = vmul.f32 %v718_v16, %v155_v15  ;;  %vm162_vm1 = vweird.f32 %v718_v16 }
  0x9f   :  { %vm163_vm3 = vmor %vm161_vm2, %vm162_vm1 }
  0xa0   :  { %v158_v18 = vsub.f32 1.0, %v157_v17 }
  0xa2   :  { %v159_v19 = vmul.f32 %v718_v16, %v158_v18 }
  0xa4   :  { %v160_v20 = vadd.f32 %v718_v16, %v159_v19 }
  0xa6   :  { %v164_v23 = vsel %vm163_vm3, %v718_v16, %v160_v20 }
  0xa7   :  { %v169_v26 = vsel %vm166_vm4, %v168_v24, %v164_v23 }
  0xa8   :  { %v172_v28 = vmul.f32 0.0, %v169_v26 }
 0x105   :  { %v175_v25 = vpop.permute.xlu0 %174 }
 0x106   :  { %v177_v27 = vmul.f32 %v175_v25, %v169_v26 }
 0x108   :  { %179 = vrot.lane.b32.xlu0 %v177_v27, %s804_s5 }
 0x17a   :  { %v180_v29 = vpop.permute.xlu0 %179 }
 0x17b   :  { %v182_v30 = vadd.f32 %v180_v29, %v172_v28 }
 0x17d   :  { %719 = vtanh.f32 %v182_v30 }
 0x183   :  { %v720_v31 = vpop.eup %719 }
 0x184   :  { %185 = vrot.lane.b32.xlu1 %v720_v31, %s804_s5 }
 0x1f6   :  { %v186_v32 = vpop.permute.xlu1 %185 }
 0x1f7   :  { %v188_v33 = vmul.f32 %v186_v32, %v169_v26 }
 0x1f9   :  { %v191_v34 = vpack.c.bf16 %v188_v33, %v188_v33 }
 0x1fb   :  { %193 = vrot.lane.b32.xlu1 %v191_v34, %s805_s3 }
 0x26d   :  { %v194_v35 = vpop.permute.xlu1 %193 }
 0x26e   :  { %683 = vmatmul.msk.bf16.vlgmr.msra.gmra.mxu2 %vm134_vm5, %v194_v35 }
 0x26f   :  { %564 = vmatpush.bf16.msra.mxu2 %v851_v2  ;;  %v94_v2 = vpop.f32.mrf.mxu0 }
 0x270   :  { %v95_v3 = vadd.f32 %v879_v6, %v94_v2 }
 0x273   :  { %565 = vmatpush.bf16.msra.mxu2 %v859_v4 }
 0x277   :  { %v96_v32 = vpop.f32.mrf.mxu0 }
 0x278   :  { %v97_v33 = vadd.f32 %v879_v6, %v96_v32 }
 0x2f1   :  { %v207_v38 = vpop.f32.mrf.mxu2 }
 0x2f2   :  { %v211_v39 = vadd.f32 %v207_v38, %v92_v37 }
 0x2f4   :  { %721 = vtanh.f32 %v211_v39  ;;  %v684_v42 = vmul.f32 -1.442695, %v211_v39 }
 0x2f6   :  { %723 = vpow2.f32 %v684_v42 }
 0x2f9   :  { %v209_v40 = vpop.f32.mrf.mxu2 }
 0x2fa   :  { %v722_v41 = vpop.eup %721 }
 0x2fb   :  { %234 = vrot.lane.b32.xlu2 %v722_v41, %s804_s5 }
 0x2fc   :  { %v724_v43 = vpop.eup %723 }
 0x2fd   :  { %v215_v44 = vadd.f32 1.0, %v724_v43 }
 0x2ff   :  { %725 = vrcp.f32 %v215_v44  ;;  %v227_v50 = vand.u32 2147483648, %v215_v44  ;;  %vm221_vm7 = vweird.f32 %v215_v44  ;;  %v225_v51 = vand.u32 2147483647, %v215_v44 }
 0x301   :  { %v228_v53 = vor.u32 1.1754944e-38, %v227_v50  ;;  %vm226_vm9 = vcmp.eq.f32.partialorder %v225_v51, 8.507059e+37 }
 0x305   :  { %v726_v45 = vpop.eup %725 }
 0x306   :  { %v217_v46 = vmul.f32 %v726_v45, %v215_v44  ;;  %vm222_vm6 = vweird.f32 %v726_v45 }
 0x307   :  { %vm223_vm8 = vmor %vm221_vm7, %vm222_vm6 }
 0x308   :  { %v218_v47 = vsub.f32 1.0, %v217_v46 }
 0x30a   :  { %v219_v48 = vmul.f32 %v726_v45, %v218_v47 }
 0x30c   :  { %v220_v49 = vadd.f32 %v726_v45, %v219_v48 }
 0x30e   :  { %v224_v52 = vsel %vm223_vm8, %v726_v45, %v220_v49 }
 0x30f   :  { %v229_v55 = vsel %vm226_vm9, %v228_v53, %v224_v52 }
 0x310   :  { %v232_v57 = vmul.f32 %v229_v55, %v182_v30 }
 0x355   :  { %v235_v54 = vpop.permute.xlu2 %234 }
 0x356   :  { %v237_v56 = vmul.f32 %v235_v54, %v229_v55 }
 0x358   :  { %239 = vrot.lane.b32.xlu2 %v237_v56, %s804_s5 }
 0x3b2   :  { %v240_v58 = vpop.permute.xlu2 %239 }
 0x3b3   :  { %v242_v59 = vadd.f32 %v240_v58, %v232_v57  ;;  %v699_v57 = vld [vmem:[%s950_s0 + $0x10] sm:$0xff] }
 0x3b4   :  { %672 = vmatmul.msk.bf16.gmra.mxu0 %vm67_vm0, %v699_v57 }
 0x3b5   :  { %727 = vtanh.f32 %v242_v59 }
 0x3bb   :  { %v728_v60 = vpop.eup %727 }
 0x3bc   :  { %245 = vrot.lane.b32.xlu0 %v728_v60, %s804_s5 }
 0x42e   :  { %v246_v62 = vpop.permute.xlu0 %245 }
 0x42f   :  { %v248_v63 = vmul.f32 %v246_v62, %v229_v55 }
 0x431   :  { %v251_v0 = vpack.c.bf16 %v248_v63, %v248_v63  ;;  %v99_v62 = vpop.f32.mrf.mxu0 }
 0x432   :  { %v100_v63 = vadd.f32 %v879_v6, %v99_v62 }
 0x433   :  { %253 = vrot.lane.b32.xlu1 %v251_v0, %s805_s3 }
 0x4a5   :  { %v254_v1 = vpop.permute.xlu1 %253 }
 0x4a6   :  { %685 = vmatmul.msk.bf16.vlgmr.msra.gmra.mxu3 %vm134_vm5, %v254_v1 }
 0x529   :  { %v267_v4 = vpop.f32.mrf.mxu3 }
 0x52a   :  { %v271_v5 = vadd.f32 %v267_v4, %v95_v3 }
 0x52c   :  { %729 = vtanh.f32 %v271_v5  ;;  %v686_v9 = vmul.f32 -1.442695, %v271_v5 }
 0x52e   :  { %731 = vpow2.f32 %v686_v9 }
 0x531   :  { %v269_v7 = vpop.f32.mrf.mxu3 }
 0x532   :  { %v730_v8 = vpop.eup %729 }
 0x533   :  { %294 = vrot.lane.b32.xlu2 %v730_v8, %s804_s5 }
 0x534   :  { %v732_v10 = vpop.eup %731 }
 0x535   :  { %v275_v11 = vadd.f32 1.0, %v732_v10 }
 0x537   :  { %733 = vrcp.f32 %v275_v11  ;;  %v287_v17 = vand.u32 2147483648, %v275_v11  ;;  %vm281_vm11 = vweird.f32 %v275_v11  ;;  %v285_v18 = vand.u32 2147483647, %v275_v11 }
 0x539   :  { %v288_v20 = vor.u32 1.1754944e-38, %v287_v17  ;;  %vm286_vm13 = vcmp.eq.f32.partialorder %v285_v18, 8.507059e+37 }
 0x53d   :  { %v734_v12 = vpop.eup %733 }
 0x53e   :  { %v277_v13 = vmul.f32 %v734_v12, %v275_v11  ;;  %vm282_vm10 = vweird.f32 %v734_v12 }
 0x53f   :  { %vm283_vm12 = vmor %vm281_vm11, %vm282_vm10 }
 0x540   :  { %v278_v14 = vsub.f32 1.0, %v277_v13 }
 0x542   :  { %v279_v15 = vmul.f32 %v734_v12, %v278_v14 }
 0x544   :  { %v280_v16 = vadd.f32 %v734_v12, %v279_v15 }
 0x546   :  { %v284_v19 = vsel %vm283_vm12, %v734_v12, %v280_v16 }
 0x547   :  { %v289_v22 = vsel %vm286_vm13, %v288_v20, %v284_v19 }
 0x548   :  { %v292_v24 = vmul.f32 %v289_v22, %v242_v59 }
 0x58d   :  { %v295_v21 = vpop.permute.xlu2 %294 }
 0x58e   :  { %v297_v23 = vmul.f32 %v295_v21, %v289_v22 }
 0x590   :  { %299 = vrot.lane.b32.xlu0 %v297_v23, %s804_s5 }
 0x602   :  { %v300_v25 = vpop.permute.xlu0 %299 }
 0x603   :  { %v302_v26 = vadd.f32 %v300_v25, %v292_v24 }
 0x605   :  { %735 = vtanh.f32 %v302_v26 }
 0x60b   :  { %v736_v27 = vpop.eup %735 }
 0x60c   :  { %305 = vrot.lane.b32.xlu1 %v736_v27, %s804_s5 }
 0x67e   :  { %v306_v28 = vpop.permute.xlu1 %305 }
 0x67f   :  { %v308_v29 = vmul.f32 %v306_v28, %v289_v22  ;;  %v101_v28 = vpop.f32.mrf.mxu0 }
 0x681   :  { %v311_v30 = vpack.c.bf16 %v308_v29, %v308_v29  ;;  %v102_v29 = vadd.f32 %v879_v6, %v101_v28 }
 0x683   :  { %313 = vrot.lane.b32.xlu2 %v311_v30, %s805_s3 }
 0x6dd   :  { %v314_v31 = vpop.permute.xlu2 %313 }
 0x6de   :  { %687 = vmatmul.msk.bf16.vlgmr.msrb.gmra.mxu1 %vm134_vm5, %v314_v31 }
 0x75b   :  { %v327_v34 = vpop.f32.mrf.mxu1 }
 0x75c   :  { %v331_v35 = vadd.f32 %v327_v34, %v97_v33 }
 0x75e   :  { %737 = vtanh.f32 %v331_v35  ;;  %v688_v38 = vmul.f32 -1.442695, %v331_v35 }
 0x760   :  { %739 = vpow2.f32 %v688_v38 }
 0x763   :  { %v329_v36 = vpop.f32.mrf.mxu1 }
 0x764   :  { %v738_v37 = vpop.eup %737 }
 0x765   :  { %354 = vrot.lane.b32.xlu0 %v738_v37, %s804_s5 }
 0x766   :  { %v740_v39 = vpop.eup %739 }
 0x767   :  { %v335_v40 = vadd.f32 1.0, %v740_v39 }
 0x769   :  { %741 = vrcp.f32 %v335_v40  ;;  %v347_v46 = vand.u32 2147483648, %v335_v40  ;;  %vm341_vm15 = vweird.f32 %v335_v40  ;;  %v345_v47 = vand.u32 2147483647, %v335_v40 }
 0x76b   :  { %v348_v49 = vor.u32 1.1754944e-38, %v347_v46  ;;  %vm346_vm2 = vcmp.eq.f32.partialorder %v345_v47, 8.507059e+37 }
 0x76f   :  { %v742_v41 = vpop.eup %741 }
 0x770   :  { %v337_v42 = vmul.f32 %v742_v41, %v335_v40  ;;  %vm342_vm14 = vweird.f32 %v742_v41 }
 0x771   :  { %vm343_vm1 = vmor %vm341_vm15, %vm342_vm14 }
 0x772   :  { %v338_v43 = vsub.f32 1.0, %v337_v42 }
 0x774   :  { %v339_v44 = vmul.f32 %v742_v41, %v338_v43 }
 0x776   :  { %v340_v45 = vadd.f32 %v742_v41, %v339_v44 }
 0x778   :  { %v344_v48 = vsel %vm343_vm1, %v742_v41, %v340_v45 }
 0x779   :  { %v349_v51 = vsel %vm346_vm2, %v348_v49, %v344_v48 }
 0x77a   :  { %v352_v53 = vmul.f32 %v349_v51, %v302_v26 }
 0x7d7   :  { %v355_v50 = vpop.permute.xlu0 %354 }
 0x7d8   :  { %v357_v52 = vmul.f32 %v355_v50, %v349_v51 }
 0x7da   :  { %359 = vrot.lane.b32.xlu1 %v357_v52, %s804_s5 }
 0x84c   :  { %v360_v54 = vpop.permute.xlu1 %359 }
 0x84d   :  { %v362_v55 = vadd.f32 %v360_v54, %v352_v53  ;;  %v700_v53 = vld [vmem:[%s950_s0 + $0x18] sm:$0xff] }
 0x84e   :  { %673 = vmatmul.msk.bf16.gmra.mxu0 %vm67_vm0, %v700_v53 }
 0x84f   :  { %743 = vtanh.f32 %v362_v55 }
 0x855   :  { %v744_v56 = vpop.eup %743 }
 0x856   :  { %365 = vrot.lane.b32.xlu2 %v744_v56, %s804_s5 }
 0x8b0   :  { %v366_v58 = vpop.permute.xlu2 %365 }
 0x8b1   :  { %v368_v59 = vmul.f32 %v366_v58, %v349_v51 }
 0x8b3   :  { %v371_v60 = vpack.c.bf16 %v368_v59, %v368_v59 }
 0x8b5   :  { %373 = vrot.lane.b32.xlu0 %v371_v60, %s805_s3 }
 0x8cb   :  { %v104_v58 = vpop.f32.mrf.mxu0 }
 0x8cc   :  { %v105_v59 = vadd.f32 %v879_v6, %v104_v58 }
 0x927   :  { %v374_v61 = vpop.permute.xlu0 %373 }
 0x928   :  { %689 = vmatmul.msk.bf16.vlgmr.msrb.gmra.mxu2 %vm134_vm5, %v374_v61 }
 0x9ab   :  { %v387_v0 = vpop.f32.mrf.mxu2 }
 0x9ac   :  { %v391_v1 = vadd.f32 %v387_v0, %v100_v63 }
 0x9ae   :  { %745 = vtanh.f32 %v391_v1  ;;  %v690_v4 = vmul.f32 -1.442695, %v391_v1 }
 0x9b0   :  { %747 = vpow2.f32 %v690_v4 }
 0x9b3   :  { %v389_v2 = vpop.f32.mrf.mxu2 }
 0x9b4   :  { %v746_v3 = vpop.eup %745 }
 0x9b5   :  { %414 = vrot.lane.b32.xlu1 %v746_v3, %s804_s5 }
 0x9b6   :  { %v748_v5 = vpop.eup %747 }
 0x9b7   :  { %v395_v7 = vadd.f32 1.0, %v748_v5 }
 0x9b9   :  { %749 = vrcp.f32 %v395_v7  ;;  %v407_v13 = vand.u32 2147483648, %v395_v7  ;;  %vm401_vm4 = vweird.f32 %v395_v7  ;;  %v405_v14 = vand.u32 2147483647, %v395_v7 }
 0x9bb   :  { %v408_v16 = vor.u32 1.1754944e-38, %v407_v13  ;;  %vm406_vm7 = vcmp.eq.f32.partialorder %v405_v14, 8.507059e+37 }
 0x9bf   :  { %v750_v8 = vpop.eup %749 }
 0x9c0   :  { %v397_v9 = vmul.f32 %v750_v8, %v395_v7  ;;  %vm402_vm3 = vweird.f32 %v750_v8 }
 0x9c1   :  { %vm403_vm6 = vmor %vm401_vm4, %vm402_vm3 }
 0x9c2   :  { %v398_v10 = vsub.f32 1.0, %v397_v9 }
 0x9c4   :  { %v399_v11 = vmul.f32 %v750_v8, %v398_v10 }
 0x9c6   :  { %v400_v12 = vadd.f32 %v750_v8, %v399_v11 }
 0x9c8   :  { %v404_v15 = vsel %vm403_vm6, %v750_v8, %v400_v12 }
 0x9c9   :  { %v409_v18 = vsel %vm406_vm7, %v408_v16, %v404_v15 }
 0x9ca   :  { %v412_v20 = vmul.f32 %v409_v18, %v362_v55 }
 0xa27   :  { %v415_v17 = vpop.permute.xlu1 %414 }
 0xa28   :  { %v417_v19 = vmul.f32 %v415_v17, %v409_v18 }
 0xa2a   :  { %419 = vrot.lane.b32.xlu2 %v417_v19, %s804_s5 }
 0xa84   :  { %v420_v21 = vpop.permute.xlu2 %419 }
 0xa85   :  { %v422_v22 = vadd.f32 %v420_v21, %v412_v20 }
 0xa87   :  { %751 = vtanh.f32 %v422_v22 }
 0xa8d   :  { %v752_v23 = vpop.eup %751 }
 0xa8e   :  { %425 = vrot.lane.b32.xlu0 %v752_v23, %s804_s5 }
 0xb00   :  { %v426_v24 = vpop.permute.xlu0 %425 }
 0xb01   :  { %v428_v25 = vmul.f32 %v426_v24, %v409_v18  ;;  %v106_v24 = vpop.f32.mrf.mxu0 }
 0xb03   :  { %v431_v26 = vpack.c.bf16 %v428_v25, %v428_v25  ;;  %v107_v25 = vadd.f32 %v879_v6, %v106_v24 }
 0xb05   :  { %433 = vrot.lane.b32.xlu1 %v431_v26, %s805_s3 }
 0xb77   :  { %v434_v27 = vpop.permute.xlu1 %433 }
 0xb78   :  { %691 = vmatmul.msk.bf16.vlgmr.msrb.gmra.mxu3 %vm134_vm5, %v434_v27 }
 0xbfb   :  { %v447_v30 = vpop.f32.mrf.mxu3 }
 0xbfc   :  { %v451_v31 = vadd.f32 %v447_v30, %v102_v29 }
 0xbfe   :  { %753 = vtanh.f32 %v451_v31  ;;  %v692_v34 = vmul.f32 -1.442695, %v451_v31 }
 0xc00   :  { %755 = vpow2.f32 %v692_v34 }
 0xc03   :  { %v449_v32 = vpop.f32.mrf.mxu3 }
 0xc04   :  { %v754_v33 = vpop.eup %753 }
 0xc05   :  { %474 = vrot.lane.b32.xlu2 %v754_v33, %s804_s5 }
 0xc06   :  { %v756_v35 = vpop.eup %755 }
 0xc07   :  { %v455_v36 = vadd.f32 1.0, %v756_v35 }
 0xc09   :  { %757 = vrcp.f32 %v455_v36  ;;  %v467_v42 = vand.u32 2147483648, %v455_v36  ;;  %vm461_vm9 = vweird.f32 %v455_v36  ;;  %v465_v43 = vand.u32 2147483647, %v455_v36 }
 0xc0b   :  { %v468_v45 = vor.u32 1.1754944e-38, %v467_v42  ;;  %vm466_vm11 = vcmp.eq.f32.partialorder %v465_v43, 8.507059e+37 }
 0xc0f   :  { %v758_v37 = vpop.eup %757 }
 0xc10   :  { %v457_v38 = vmul.f32 %v758_v37, %v455_v36  ;;  %vm462_vm8 = vweird.f32 %v758_v37 }
 0xc11   :  { %vm463_vm10 = vmor %vm461_vm9, %vm462_vm8 }
 0xc12   :  { %v458_v39 = vsub.f32 1.0, %v457_v38 }
 0xc14   :  { %v459_v40 = vmul.f32 %v758_v37, %v458_v39 }
 0xc16   :  { %v460_v41 = vadd.f32 %v758_v37, %v459_v40 }
 0xc18   :  { %v464_v44 = vsel %vm463_vm10, %v758_v37, %v460_v41 }
 0xc19   :  { %v469_v47 = vsel %vm466_vm11, %v468_v45, %v464_v44  ;;  %v711_v44 = vld [vmem:[%s954_s4] ss:$0 sm:$0xff]  ;;  %s806_s4 = smov [#allocation4]  }
 0xc1a   :  { %v472_v49 = vmul.f32 %v469_v47, %v422_v22  ;;  %s639_s14 = sshll.u32 %s806_s4, 4  ;;  %s640_s14 = int_to_ptr.vmem [resolvable:$true] %s639_s14 }
 0xc5f   :  { %v475_v46 = vpop.permute.xlu2 %474 }
 0xc60   :  { %v477_v48 = vmul.f32 %v475_v46, %v469_v47 }
 0xc62   :  { %479 = vrot.lane.b32.xlu0 %v477_v48, %s804_s5 }
 0xcd4   :  { %v480_v50 = vpop.permute.xlu0 %479 }
 0xcd5   :  { %v482_v51 = vadd.f32 %v480_v50, %v472_v49 }
 0xcd7   :  { %759 = vtanh.f32 %v482_v51 }
 0xcdd   :  { %v760_v52 = vpop.eup %759 }
 0xcde   :  { %485 = vrot.lane.b32.xlu1 %v760_v52, %s804_s5 }
 0xd50   :  { %v486_v54 = vpop.permute.xlu1 %485 }
 0xd51   :  { %v488_v55 = vmul.f32 %v486_v54, %v469_v47 }
 0xd53   :  { %v491_v56 = vpack.c.bf16 %v488_v55, %v488_v55  ;;  %v712_v55 = vld [vmem:[#allocation3] ss:$0 sm:$0xff] }
 0xd55   :  { %493 = vrot.lane.b32.xlu2 %v491_v56, %s805_s3 }
 0xdaf   :  { %v494_v57 = vpop.permute.xlu2 %493 }
 0xdb0   :  { %693 = vmatmul.msk.bf16.vlgmr.msra.gmra.mxu1 %vm134_vm5, %v494_v57 }
 0xe2d   :  { %v507_v60 = vpop.f32.mrf.mxu1 }
 0xe2e   :  { %v511_v61 = vadd.f32 %v507_v60, %v105_v59 }
 0xe30   :  { %761 = vtanh.f32 %v511_v61  ;;  %v694_v0 = vmul.f32 -1.442695, %v511_v61 }
 0xe32   :  { %763 = vpow2.f32 %v694_v0 }
 0xe35   :  { %v509_v62 = vpop.f32.mrf.mxu1 }
 0xe36   :  { %v762_v63 = vpop.eup %761 }
 0xe37   :  { %534 = vrot.lane.b32.xlu0 %v762_v63, %s804_s5 }
 0xe38   :  { %v764_v1 = vpop.eup %763 }
 0xe39   :  { %v515_v2 = vadd.f32 1.0, %v764_v1 }
 0xe3b   :  { %765 = vrcp.f32 %v515_v2  ;;  %v527_v9 = vand.u32 2147483648, %v515_v2  ;;  %vm521_vm12 = vweird.f32 %v515_v2  ;;  %v525_v10 = vand.u32 2147483647, %v515_v2 }
 0xe3d   :  { %v528_v12 = vor.u32 1.1754944e-38, %v527_v9  ;;  %vm526_vm14 = vcmp.eq.f32.partialorder %v525_v10, 8.507059e+37 }
 0xe41   :  { %v766_v3 = vpop.eup %765 }
 0xe42   :  { %v517_v4 = vmul.f32 %v766_v3, %v515_v2  ;;  %vm522_vm0 = vweird.f32 %v766_v3 }
 0xe43   :  { %vm523_vm13 = vmor %vm521_vm12, %vm522_vm0 }
 0xe44   :  { %v518_v5 = vsub.f32 1.0, %v517_v4 }
 0xe46   :  { %v519_v7 = vmul.f32 %v766_v3, %v518_v5 }
 0xe48   :  { %v520_v8 = vadd.f32 %v766_v3, %v519_v7 }
 0xe4a   :  { %v524_v11 = vsel %vm523_vm13, %v766_v3, %v520_v8 }
 0xe4b   :  { %v529_v14 = vsel %vm526_vm14, %v528_v12, %v524_v11 }
 0xe4c   :  { %v532_v16 = vmul.f32 %v529_v14, %v482_v51 }
 0xea9   :  { %v535_v13 = vpop.permute.xlu0 %534 }
 0xeaa   :  { %v537_v15 = vmul.f32 %v535_v13, %v529_v14 }
 0xeac   :  { %539 = vrot.lane.b32.xlu1 %v537_v15, %s804_s5 }
 0xf1e   :  { %v540_v17 = vpop.permute.xlu1 %539 }
 0xf1f   :  { %v542_v18 = vadd.f32 %v540_v17, %v532_v16 }
 0xf21   :  { %767 = vtanh.f32 %v542_v18 }
 0xf27   :  { %v768_v19 = vpop.eup %767 }
 0xf28   :  { %545 = vrot.lane.b32.xlu2 %v768_v19, %s804_s5 }
 0xf82   :  { %v546_v20 = vpop.permute.xlu2 %545 }
 0xf83   :  { %v548_v21 = vmul.f32 %v546_v20, %v529_v14 }
 0xf85   :  { %v551_v22 = vpack.c.bf16 %v548_v21, %v548_v21 }
 0xf87   :  { %553 = vrot.lane.b32.xlu0 %v551_v22, %s805_s3 }
 0xff9   :  { %v554_v23 = vpop.permute.xlu0 %553 }
 0xffa   :  { %695 = vmatmul.msk.bf16.vlgmr.msra.gmra.mxu2 %vm134_vm5, %v554_v23 }
0x107d   :  { %v567_v26 = vpop.f32.mrf.mxu2 }
0x107e   :  { %v571_v27 = vadd.f32 %v567_v26, %v107_v25 }
0x1080   :  { %769 = vtanh.f32 %v571_v27  ;;  %v696_v30 = vmul.f32 -1.442695, %v571_v27 }
0x1082   :  { %771 = vpow2.f32 %v696_v30 }
0x1085   :  { %v569_v28 = vpop.f32.mrf.mxu2 }
0x1086   :  { %v770_v29 = vpop.eup %769 }
0x1087   :  { %594 = vrot.lane.b32.xlu1 %v770_v29, %s804_s5 }
0x1088   :  { %v772_v31 = vpop.eup %771 }
0x1089   :  { %v575_v32 = vadd.f32 1.0, %v772_v31 }
0x108b   :  { %773 = vrcp.f32 %v575_v32  ;;  %v587_v38 = vand.u32 2147483648, %v575_v32  ;;  %vm581_vm1 = vweird.f32 %v575_v32  ;;  %v585_v6 = vand.u32 2147483647, %v575_v32 }
0x108d   :  { %v588_v40 = vor.u32 1.1754944e-38, %v587_v38  ;;  %vm586_vm3 = vcmp.eq.f32.partialorder %v585_v6, 8.507059e+37 }
0x108f   :  { %612 = vrot.lane.b32.xlu1 %v711_v44, %s805_s3 }
0x1091   :  { %v774_v33 = vpop.eup %773 }
0x1092   :  { %v577_v34 = vmul.f32 %v774_v33, %v575_v32  ;;  %vm582_vm15 = vweird.f32 %v774_v33 }
0x1093   :  { %vm583_vm2 = vmor %vm581_vm1, %vm582_vm15 }
0x1094   :  { %v578_v35 = vsub.f32 1.0, %v577_v34 }
0x1096   :  { %v579_v36 = vmul.f32 %v774_v33, %v578_v35 }
0x1098   :  { %v580_v37 = vadd.f32 %v774_v33, %v579_v36 }
0x109a   :  { %v584_v39 = vsel %vm583_vm2, %v774_v33, %v580_v37 }
0x109b   :  { %v589_v42 = vsel %vm586_vm3, %v588_v40, %v584_v39 }
0x109c   :  { %v592_v45 = vmul.f32 %v589_v42, %v542_v18 }
0x10f9   :  { %v595_v41 = vpop.permute.xlu1 %594 }
0x10fa   :  { %v597_v43 = vmul.f32 %v595_v41, %v589_v42 }
0x10fc   :  { %599 = vrot.lane.b32.xlu2 %v597_v43, %s804_s5 }
0x1101   :  { %v613_v50 = vpop.permute.xlu1 %612 }
0x1156   :  { %v600_v46 = vpop.permute.xlu2 %599 }
0x1157   :  { %v602_v47 = vadd.f32 %v600_v46, %v592_v45 }
0x1159   :  { %775 = vtanh.f32 %v602_v47 }
0x115f   :  { %v776_v48 = vpop.eup %775 }
0x1160   :  { %605 = vrot.lane.b32.xlu0 %v776_v48, %s804_s5 }
0x11d2   :  { %v606_v49 = vpop.permute.xlu0 %605 }
0x11d3   :  { %v608_v51 = vmul.f32 %v606_v49, %v589_v42 }
0x11d5   :  { %v615_v52 = vmul.f32 %v613_v50, %v608_v51 }
0x11d7   :  { %617 = vrot.lane.b32.xlu2 %v615_v52, %s805_s3 }
0x1231   :  { %v618_v53 = vpop.permute.xlu2 %617 }
0x1232   :  { %v620_v54 = vsel %vm134_vm5, %v618_v53, 0.0 }
0x1233   :  { %621 = vadd.xlane.f32.xlu0 %v620_v54 }
0x12a6   :  { %v622_v56 = vpop.xlane.xlu0 %621 }
0x12a7   :  { %v627_v57 = vadd.f32 %v712_v55, %v622_v56 }
0x12a9   :  { %630 = vperm.xlu1 %708, %v627_v57  }
0x131b   :  { %v631_v58 = vpop.permute.xlu1 %630 }
0x131c   :  { %633 = vst [vmem:[#allocation4] sm:$0xff] %v631_v58 }
0x131d   :  { %644 = dma.vmem_to_hbm [thread:$0]  %s640_s14, 128, %s642_s17, [#allocation5]  }
0x131e   :  { %801 = dma.done.wait [#allocation5], 128  }
0x131f   :  { %802 = vsyncadd [#allocation5], 4294967168 }
0x1320   :  { %649 = vsyncpa [#allocation5], 1 }

</bundles_post_ra>
